<compile_context>
chip_gen: v5e
topology: v5e:2x2
jax: 0.10.0
libtpu: 0.0.40
codegen_flags: <defaults>
</compile_context>

<pallas_src>
import math

import jax
import jax.numpy as jnp
from jax.experimental import pallas as pl
from jax.experimental.pallas import tpu as pltpu


# ----------------------------------------------------------------- tiling util
def _choose_tile(dim, preferred, align):
    """Largest multiple of `align` that is <= `preferred` and divides `dim`.
    Falls back to the full dim (always a legal BlockSpec block size)."""
    if dim <= preferred:
        return dim
    t = (preferred // align) * align
    while t >= align:
        if dim % t == 0:
            return t
        t -= align
    return dim


# ------------------------------------------------------- mask-fold prep kernel
def _fold_mask_kernel(w_ref, m_ref, o_ref):
    # One-time tiled elementwise fold: w_eff = weight * mask, stored as bf16.
    o_ref[...] = (w_ref[...] * m_ref[...]).astype(o_ref.dtype)


def fold_mask(weight, mask, out_dtype=jnp.bfloat16):
    """weight, mask: (N, K) -> (N, K) out_dtype, elementwise product."""
    N, K = weight.shape
    tn = _choose_tile(N, 256, 8)
    tk = _choose_tile(K, 512, 128)
    return pl.pallas_call(
        _fold_mask_kernel,
        out_shape=jax.ShapeDtypeStruct((N, K), out_dtype),
        grid_spec=pltpu.PrefetchScalarGridSpec(
            num_scalar_prefetch=0,
            grid=(N // tn, K // tk),
            in_specs=[pl.BlockSpec((tn, tk), lambda i, j: (i, j)),
                      pl.BlockSpec((tn, tk), lambda i, j: (i, j))],
            out_specs=pl.BlockSpec((tn, tk), lambda i, j: (i, j)),
        ),
        compiler_params=pltpu.CompilerParams(
            dimension_semantics=("parallel", "parallel")),
    )(weight.astype(jnp.float32), mask.astype(jnp.float32))


# --------------------------------------------------------- main matmul kernels
def _matmul_bias_kernel(x_ref, w_ref, b_ref, o_ref, acc_ref):
    k = pl.program_id(2)

    @pl.when(k == 0)
    def _():
        acc_ref[...] = jnp.zeros_like(acc_ref)

    # NT contraction: (tm, tk) . (tn, tk) over the last dim of both -> (tm, tn)
    acc_ref[...] += jax.lax.dot_general(
        x_ref[...], w_ref[...],
        dimension_numbers=(((1,), (1,)), ((), ())),
        preferred_element_type=jnp.float32)

    @pl.when(k == pl.num_programs(2) - 1)
    def _():
        o_ref[...] = (acc_ref[...] + b_ref[...]).astype(o_ref.dtype)


def _matmul_nobias_kernel(x_ref, w_ref, o_ref, acc_ref):
    k = pl.program_id(2)

    @pl.when(k == 0)
    def _():
        acc_ref[...] = jnp.zeros_like(acc_ref)

    acc_ref[...] += jax.lax.dot_general(
        x_ref[...], w_ref[...],
        dimension_numbers=(((1,), (1,)), ((), ())),
        preferred_element_type=jnp.float32)

    @pl.when(k == pl.num_programs(2) - 1)
    def _():
        o_ref[...] = acc_ref[...].astype(o_ref.dtype)


# ------------------------------------------------------------------- wrapper
def masked_linear(x, weight, mask=None, bias=None, *,
                  tm_pref=128, tn_pref=256, tk_pref=512):
    """CustomizedLinear forward.

    x: (B, K) f32; weight: (N, K); mask: (N, K) 0/1 or None; bias: (N,) or None.
    Returns (B, N) f32.
    """
    B, K = x.shape
    N, K2 = weight.shape
    assert K == K2

    # Fold the static mask into the weight once (Pallas prep kernel) and move
    # both matmul operands to bf16: halves weight HBM traffic, removes the mask
    # stream entirely, and uses the bf16-native MXU.
    if mask is not None:
        w_eff = fold_mask(weight, mask)
    else:
        w_eff = weight.astype(jnp.bfloat16)
    x_bf16 = x.astype(jnp.bfloat16)

    tm = _choose_tile(B, tm_pref, 8)      # B is small; don't waste VMEM on M
    tn = _choose_tile(N, tn_pref, 128)    # lane-dense output stores
    tk = _choose_tile(K, tk_pref, 128)
    grid = (B // tm, N // tn, K // tk)

    x_spec = pl.BlockSpec((tm, tk), lambda i, j, k: (i, k))
    w_spec = pl.BlockSpec((tn, tk), lambda i, j, k: (j, k))
    o_spec = pl.BlockSpec((tm, tn), lambda i, j, k: (i, j))
    scratch = [pltpu.VMEM((tm, tn), jnp.float32)]
    cparams = pltpu.CompilerParams(
        dimension_semantics=("parallel", "parallel", "arbitrary"),
        vmem_limit_bytes=32 * 1024 * 1024)  # explicit; leaves headroom on v7x

    if bias is not None:
        b2 = bias.reshape(1, N).astype(jnp.float32)
        b_spec = pl.BlockSpec((1, tn), lambda i, j, k: (0, j))
        return pl.pallas_call(
            _matmul_bias_kernel,
            out_shape=jax.ShapeDtypeStruct((B, N), jnp.float32),
            grid_spec=pltpu.PrefetchScalarGridSpec(
                num_scalar_prefetch=0, grid=grid,
                in_specs=[x_spec, w_spec, b_spec],
                out_specs=o_spec,
                scratch_shapes=scratch),
            compiler_params=cparams,
        )(x_bf16, w_eff, b2)

    # bias=False path: dedicated kernel, no zero-bias DMA / add.
    return pl.pallas_call(
        _matmul_nobias_kernel,
        out_shape=jax.ShapeDtypeStruct((B, N), jnp.float32),
        grid_spec=pltpu.PrefetchScalarGridSpec(
            num_scalar_prefetch=0, grid=grid,
            in_specs=[x_spec, w_spec],
            out_specs=o_spec,
            scratch_shapes=scratch),
        compiler_params=cparams,
    )(x_bf16, w_eff)


# --------------------------------------------------------------- init replica
def init_customized_linear(key, input_features, output_features, use_bias=True,
                           mask_in_out=None):
    """Deterministic replica of CustomizedLinear.__init__ / init_params."""
    stdv = 1.0 / math.sqrt(input_features)
    kw, kb = jax.random.split(key)
    weight = jax.random.uniform(kw, (output_features, input_features),
                                jnp.float32, minval=-stdv, maxval=stdv)
    bias = (jax.random.uniform(kb, (output_features,), jnp.float32,
                               minval=-stdv, maxval=stdv)
            if use_bias else None)
    if mask_in_out is not None:
        # module stores the user-facing (in, out) mask transposed: (out, in)
        mask = jnp.asarray(mask_in_out, jnp.float32).T
    else:
        mask = None
    return weight, bias, mask


if __name__ == "__main__":
    # Small but multi-tile: grid = (1, 2, 2) exercises the K accumulator and
    # the N-parallel axis while staying tiny (weight = 2 MiB).
    B, IN, OUT = 16, 1024, 512

    key = jax.random.PRNGKey(0)
    kx, kp = jax.random.split(key)

    x = jax.random.normal(kx, (B, IN), jnp.float32)

    # deterministic 0/1 connectivity mask, user-facing shape (in, out)
    ii = jnp.arange(IN)[:, None]
    jj = jnp.arange(OUT)[None, :]
    mask_in_out = ((ii + jj) % 3 != 0).astype(jnp.float32)

    weight, bias, mask = init_customized_linear(kp, IN, OUT, use_bias=True,
                                                mask_in_out=mask_in_out)

    y = jax.block_until_ready(masked_linear(x, weight, mask, bias))
    assert y.shape == (B, OUT)

    # Reference with identical bf16 rounding of the operands (f32 math).
    w_eff_ref = (weight * mask).astype(jnp.bfloat16).astype(jnp.float32)
    x_rnd = x.astype(jnp.bfloat16).astype(jnp.float32)
    y_ref = x_rnd @ w_eff_ref.T + bias[None, :]
    assert jnp.allclose(y, y_ref, atol=2e-4, rtol=2e-4), \
        float(jnp.max(jnp.abs(y - y_ref)))

    # Loose check against full-f32 math (bounds the bf16 operand rounding).
    y_f32 = x @ (weight * mask).T + bias[None, :]
    assert jnp.allclose(y, y_f32, atol=5e-2, rtol=5e-2)

    # bias=False path (dedicated kernel, no bias DMA).
    y_nb = jax.block_until_ready(masked_linear(x, weight, mask, None))
    assert jnp.allclose(y_nb, y_ref - bias[None, :], atol=2e-4, rtol=2e-4)

    # mask=None path (no fold kernel, straight bf16 weight).
    y_nm = jax.block_until_ready(masked_linear(x, weight, None, bias))
    y_nm_ref = x_rnd @ weight.astype(jnp.bfloat16).astype(jnp.float32).T + bias[None, :]
    assert jnp.allclose(y_nm, y_nm_ref, atol=2e-4, rtol=2e-4)

    # TODO(synk): LinearFunction.backward (custom autograd) is not implemented;
    # only the forward pass is translated.
    print("KERNEL_OK")
</pallas_src>

<mosaic_0001>
module attributes {stable_mosaic.version = 11 : i64} {
  func.func @_fold_mask_kernel(%arg0: i32, %arg1: i32, %arg2: memref<256x512xf32, #tpu.memory_space<vmem>>, %arg3: memref<256x512xf32, #tpu.memory_space<vmem>>, %arg4: memref<256x512xbf16, #tpu.memory_space<vmem>>) attributes {dimension_semantics = [#tpu.dimension_semantics<parallel>, #tpu.dimension_semantics<parallel>], iteration_bounds = array<i64: 2, 2>, scalar_prefetch = 0 : i64, scratch_operands = 0 : i64, tpu.core_type = #tpu.core_type<tc>, window_params = [{transform_indices = @transform_0, window_bounds = array<i64: 256, 512>}, {transform_indices = @transform_1, window_bounds = array<i64: 256, 512>}, {transform_indices = @transform_2, window_bounds = array<i64: 256, 512>}]} {
    %c0 = arith.constant 0 : index
    %c0_0 = arith.constant 0 : index
    %0 = vector.load %arg2[%c0, %c0_0] : memref<256x512xf32, #tpu.memory_space<vmem>>, vector<256x512xf32>
    %c0_1 = arith.constant 0 : index
    %c0_2 = arith.constant 0 : index
    %1 = vector.load %arg3[%c0_1, %c0_2] : memref<256x512xf32, #tpu.memory_space<vmem>>, vector<256x512xf32>
    %2 = arith.mulf %0, %1 : vector<256x512xf32>
    %3 = arith.truncf %2 : vector<256x512xf32> to vector<256x512xbf16>
    %c0_3 = arith.constant 0 : index
    %c0_4 = arith.constant 0 : index
    %4 = vector.load %arg4[%c0_3, %c0_4] : memref<256x512xbf16, #tpu.memory_space<vmem>>, vector<256x512xbf16>
    tpu.vector_store %arg4[%c0_3, %c0_4], %3 {strides = array<i32>} : memref<256x512xbf16, #tpu.memory_space<vmem>>, vector<256x512xbf16>,
    return
  }
  func.func @transform_0(%arg0: i32, %arg1: i32) -> (i32, i32) {
    %c0_i32 = arith.constant 0 : i32
    return %arg0, %arg1 : i32, i32
  }
  func.func @transform_1(%arg0: i32, %arg1: i32) -> (i32, i32) {
    %c0_i32 = arith.constant 0 : i32
    return %arg0, %arg1 : i32, i32
  }
  func.func @transform_2(%arg0: i32, %arg1: i32) -> (i32, i32) {
    %c0_i32 = arith.constant 0 : i32
    return %arg0, %arg1 : i32, i32
  }
}

</mosaic_0001>

<bundles_post_ra>
// kernel: tpu_custom_call.1
= control target key start
LH: loop header
LB: loop body
LE: loop exit
PB: predicated region body
PF: predicated region fallthrough
CT: control target
= control target key end

     0   :  { %s1679_s0 = inlined_call_operand.hbm [shape: f32[512,1024], index: 0, kind: input, shape index: {}]   ;;  %s1680_s1 = inlined_call_operand.hbm [shape: f32[512,1024], index: 1, kind: input, shape index: {}]   ;;  %s1681_s2 = inlined_call_operand.hbm [shape: bf16[512,1024], index: 2, kind: output, shape index: {}]  }
   0x1   :  { %1685 = sst [smem:[#allocation14_spill]] %s1679_s0 }
   0x2   :  { %7 = vsyncpa [#allocation3], 0 }
   0x3   :  { %9 = vsyncpa [#allocation3 + $0x1], 0 }
   0x4   :  { %10 = vsyncpa [#allocation6], 0 }
   0x5   :  { %12 = vsyncpa [#allocation6 + $0x1], 0 }
   0x6   :  { %13 = vsyncpa [#allocation4], 0 }
   0x7   :  { %15 = vsyncpa [#allocation4 + $0x1], 0  ;;  %s1185_s9 = smov 0   ;;  %s1187_s10 = smov 0  }
   0x8   :  { %s1189_s11 = smov 0   ;;  %s1191_s12 = smov 0  }
   0x9   :  { %s1193_s13 = smov 0   ;;  %s1195_s14 = smov 0  }
   0xa   :  { %s1197_s15 = smov 0   ;;  %s1199_s16 = smov 0  }
   0xb LB: > { %1686 = sst [smem:[#allocation11_spill]] %s1158_s15  ;;  %s883_s17 = sadd.s32 4294967295, %s1162_s16   ;;  %s1162_s16 = sphi %s1199_s16, %s21_s16   ;;  %s1158_s15 = sphi %s1197_s15, %s1697_s15   ;;  %s1154_s14 = sphi %s1195_s14, %s1702_s14   ;;  %s1150_s13 = sphi %s1193_s13, %s1695_s13   ;;  %s1146_s12 = sphi %s1191_s12, %s1701_s12   ;;  %s1142_s11 = sphi %s1189_s11, %s1700_s11   ;;  %s1138_s10 = sphi %s1187_s10, %s1699_s10   ;;  %s1134_s9 = sphi %s1185_s9, %s1698_s9  }
   0xc   : > { %s884_s18 = sadd.s32 4294967294, %s1162_s16   ;;  %s30_s19 = sadd.s32 1, %s1154_s14 }
   0xd   : > { %s33_s20 = sadd.s32 1, %s1158_s15  ;;  %p31_p0 = scmp.ge.s32.totalorder %s30_s19, 2 }
   0xe   : > { %s42_s21 = sadd.s32 1, %s1142_s11  ;;  %p49_p1 = scmp.ne.s32.totalorder %s1142_s11, %s1138_s10 }
   0xf   : > { %p50_p2 = scmp.eq.s32.totalorder %s1162_s16, 0  ;;  %s1704_s19 = smov (%p31_p0, %s30_s19), 0 }
  0x10   : > { %1687 = sst [smem:[#allocation12_spill]] %s1704_s19  ;;  %s1706_s20 = smov (!%p31_p0, %s33_s20), %s1158_s15 }
  0x11   : > { %s38_s22 = ssub.s32 %s1154_s14, %s1704_s19  ;;  %p1238_p3 = por %p50_p2, %p49_p1 }
  0x12   : > { %p35_p4 = scmp.ge.s32.totalorder %s1706_s20, 2  ;;  %p55_p5 = scmp.ne.s32.totalorder %s1138_s10, %s1134_s9 }
  0x13   : > { %p56_p6 = scmp.eq.s32.totalorder %s883_s17, 0  ;;  %p109_p7 = scmp.eq.s32.totalorder %s883_s17, 3 }
  0x14   : > { %s1708_s20 = smov (%p35_p4, %s1706_s20), 0  ;;  %p115_p10 = scmp.eq.s32.totalorder %s884_s18, 3 }
  0x15   : > { %1689 = sst [smem:[#allocation13_spill]] %s1708_s20  ;;  %p1246_p8 = por %p56_p6, %p55_p5 }
  0x16   : > { %p1250_p9 = por %p109_p7, %p49_p1  ;;  %s37_s26 = ssub.s32 %s1158_s15, %s1708_s20 }
  0x17   : > { %s39_s27 = sor.u32 %s38_s22, %s37_s26  ;;  %p1256_p12 = por %p115_p10, %p55_p5 }
  0x18   : > { %p40_p11 = scmp.eq.s32.totalorder %s39_s27, 0  ;;  %p928_p13 = scmp.lt.s32.totalorder %s1162_s16, 4 }
  0x19   : > { %s1262_s29 = sand.u32 1, %s1142_s11   ;;  %s889_s4 = sshll.u32 %s1154_s14, 2 }
  0x1a   : > { %s1265_s30 = scalar_select %p40_p11, %s1142_s11, %s42_s21  }
  0x1b   : > { %s887_s3 = sshll.u32 %s1262_s29, 10  ;;  %s908_s5 = sshll.u32 %s1158_s15, 8 }
  0x1c   : > { %s139_s6 = scalar_lea.vmem [#allocation2], %s887_s3  ;;  %s145_s8 = sadd.s32 %s908_s5, %s889_s4 }
  0x1d   : > { %s150_s7 = sshll.u32 %s139_s6, 4  ;;  %s891_s17 = sshll.u32 %s145_s8, 3  ;;  %s151_s7 = int_to_ptr.vmem [resolvable:$true] %s150_s7 }
  0x1e   : > { %p1272_p0 = pnand %p928_p13, %p1238_p3  ;;  %s1694_s0 = sld [smem:[#allocation14_spill]] }
  0x1f   : > { %p897_p1 = scmp.ge.s32.totalorder %s1162_s16, 1  ;;  %s136_s20 = scalar_lea.sflag [#allocation3], %s1262_s29 }
  0x20   : > { %s1164_s6 = smov 1024   ;;  %s1165_s4 = smov 512  }
  0x21   : > { %s1166_s5 = smov 32   ;;  %p183_p2 = scmp.lt.s32.totalorder %s1162_s16, 5 }
  0x22   : > { %s172_s19 = scalar_lea.hbm %s1680_s1, %s891_s17  ;;  %s164_s26 = scalar_lea.vmem [#allocation5], %s887_s3 }
  0x23   : > { %p184_p3 = pnand %p897_p1, %p183_p2  ;;  %s173_s22 = sshll.u32 %s172_s19, 4  ;;  %s174_s22 = int_to_ptr.hbm [resolvable:$true] %s173_s22 }
  0x24   : > { %s147_s21 = scalar_lea.hbm %s1694_s0, %s891_s17  ;;  %s161_s0 = scalar_lea.sflag [#allocation6], %s1262_s29 }
  0x25   : > { %s148_s27 = sshll.u32 %s147_s21, 4  ;;  %s175_s21 = sshll.u32 %s164_s26, 4  ;;  %s149_s27 = int_to_ptr.hbm [resolvable:$true] %s148_s27  ;;  %s176_s21 = int_to_ptr.vmem [resolvable:$true] %s175_s21 }
  0x26   : > { %920 = dma.hbm_to_vmem [thread:$0]  (!%p1272_p0), %s149_s27, 16384, %s151_s7, %s136_s20, %s1164_s6, %s1165_s4, %s1166_s5  }
  0x27   : > { %923 = dma.hbm_to_vmem [thread:$0]  (!%p1272_p0), %s174_s22, 16384, %s176_s21, %s161_s0, %s1164_s6, %s1165_s4, %s1166_s5  }
  0x28   : > { %187 = sbr.rel (%p184_p3) target bundleno = 143 (0x8f), region = 28  ;;  %s1291_s15 = sand.u32 (!%p184_p3), 1, %s1138_s10  }
  0x29   : > { %s898_s20 = sshll.u32 (!%p184_p3), %s1291_s15, 10  ;;  %s190_s7 = scalar_lea.sflag (!%p184_p3), [#allocation3], %s1291_s15 }
  0x2a   : > { %s1295_s27 = scalar_lea.vmem (!%p184_p3), [#allocation2], %s898_s20 }
  0x2d   : > { %1121 = dma.done.wait (%p1246_p8), %s190_s7, 16384  }
  0x2e   : > { %1123 = vsyncadd (%p1246_p8), %s190_s7, 4294950912  ;;  %s200_s19 = scalar_lea.sflag [#allocation6], %s1291_s15  ;;  %s1302_s0 = scalar_lea.vmem [#allocation5], %s898_s20 }
  0x2f   : > { %1125 = dma.done.wait (%p1246_p8), %s200_s19, 16384  }
  0x30   : > { %1127 = vsyncadd (%p1246_p8), %s200_s19, 4294950912  ;;  %s900_s29 = sshll.u32 %s1291_s15, 9  ;;  %v236_v0 = vld [vmem:[%s1295_s27] sm:$0xff]  ;;  %v237_v1 = vld [vmem:[%s1295_s27 + $0x8] sm:$0xff]  ;;  %s903_s3 = sshll.u32 %s1146_s12, 2 }
  0x31   : > { %v364_v2 = vld [vmem:[%s1302_s0] sm:$0xff]  ;;  %v365_v3 = vld [vmem:[%s1302_s0 + $0x8] sm:$0xff]  ;;  %v238_v5 = vld [vmem:[%s1295_s27 + $0x10] sm:$0xff]  ;;  %s1327_s24 = scalar_lea.vmem [#allocation7], %s900_s29  ;;  %s910_s17 = sshll.u32 %s1150_s13, 8 }
  0x32   : > { %v492_v4 = vmul.f32 %v364_v2, %v236_v0  ;;  %v239_v6 = vld [vmem:[%s1295_s27 + $0x18] sm:$0xff]  ;;  %v493_v7 = vmul.f32 %v365_v3, %v237_v1  ;;  %v366_v8 = vld [vmem:[%s1302_s0 + $0x10] sm:$0xff]  ;;  %v240_v10 = vld [vmem:[%s1295_s27 + $0x20] sm:$0xff]  ;;  %s1598_s12 = sadd.s32 %s910_s17, %s903_s3  ;;  %s764_s5 = sshll.u32 %s1327_s24, 4  ;;  %s765_s5 = int_to_ptr.vmem [resolvable:$true] %s764_s5 }
  0x33   : > { %v367_v9 = vld [vmem:[%s1302_s0 + $0x18] sm:$0xff]  ;;  %v494_v11 = vmul.f32 %v366_v8, %v238_v5  ;;  %v241_v13 = vld [vmem:[%s1295_s27 + $0x28] sm:$0xff]  ;;  %v368_v14 = vld [vmem:[%s1302_s0 + $0x20] sm:$0xff]  ;;  %s905_s13 = sshll.u32 %s1598_s12, 2  ;;  %s749_s8 = scalar_lea.sflag [#allocation4], %s1291_s15 }
  0x34   : > { %v495_v12 = vmul.f32 %v367_v9, %v239_v6  ;;  %v369_v15 = vld [vmem:[%s1302_s0 + $0x28] sm:$0xff]  ;;  %v620_v16 = vpack.c.bf16 %v493_v7, %v492_v4  ;;  %v496_v17 = vmul.f32 %v368_v14, %v240_v10  ;;  %v242_v19 = vld [vmem:[%s1295_s27 + $0x30] sm:$0xff]  ;;  %v243_v20 = vld [vmem:[%s1295_s27 + $0x38] sm:$0xff]  ;;  %s763_s4 = scalar_lea.hbm %s1681_s2, %s905_s13  ;;  %s1080_s7 = scalar_lea.hbm %s1681_s2, 2048 }
  0x35   : > { %v497_v18 = vmul.f32 %v369_v15, %v241_v13  ;;  %v370_v21 = vld [vmem:[%s1302_s0 + $0x30] sm:$0xff]  ;;  %v371_v23 = vld [vmem:[%s1302_s0 + $0x38] sm:$0xff]  ;;  %v244_v25 = vld [vmem:[%s1295_s27 + $0x40] sm:$0xff]  ;;  %s766_s23 = sshll.u32 %s763_s4, 4  ;;  %s767_s23 = int_to_ptr.hbm [resolvable:$true] %s766_s23 }
  0x36   : > { %v621_v22 = vpack.c.bf16 %v495_v12, %v494_v11  ;;  %v498_v24 = vmul.f32 %v370_v21, %v242_v19  ;;  %v245_v26 = vld [vmem:[%s1295_s27 + $0x48] sm:$0xff]  ;;  %684 = vst [vmem:[%s1327_s24] sm:$0xff] %v620_v16  ;;  %v499_v28 = vmul.f32 %v371_v23, %v243_v20  ;;  %v372_v29 = vld [vmem:[%s1302_s0 + $0x40] sm:$0xff]  ;;  %v246_v31 = vld [vmem:[%s1295_s27 + $0x50] sm:$0xff]  ;;  %s1074_s22 = sshra.s32 %s767_s23, 4  ;;  %s1075_s22 = int_to_ptr.hbm [resolvable:$true] %s1074_s22 }
  0x37   : > { %v622_v27 = vpack.c.bf16 %v497_v18, %v496_v17  ;;  %v373_v30 = vld [vmem:[%s1302_s0 + $0x48] sm:$0xff]  ;;  %v500_v32 = vmul.f32 %v372_v29, %v244_v25  ;;  %v247_v34 = vld [vmem:[%s1295_s27 + $0x58] sm:$0xff]  ;;  %v374_v35 = vld [vmem:[%s1302_s0 + $0x50] sm:$0xff]  ;;  %s1076_s26 = scalar_lea.hbm %s1075_s22, 512  ;;  %p1081_p7 = scmp.lt.s32.totalorder %s1075_s22, %s1681_s2 }
  0x38   : > { %685 = vst [vmem:[%s1327_s24 + $0x8] sm:$0xff] %v621_v22  ;;  %v501_v33 = vmul.f32 %v373_v30, %v245_v26  ;;  %v375_v36 = vld [vmem:[%s1302_s0 + $0x58] sm:$0xff]  ;;  %v623_v37 = vpack.c.bf16 %v499_v28, %v498_v24  ;;  %v502_v38 = vmul.f32 %v374_v35, %v246_v31  ;;  %v248_v40 = vld [vmem:[%s1295_s27 + $0x60] sm:$0xff]  ;;  %v249_v41 = vld [vmem:[%s1295_s27 + $0x68] sm:$0xff]  ;;  %p1077_p4 = scmp.ne.s32.totalorder %s1075_s22, %s1076_s26  ;;  %p1082_p8 = scmp.lt.s32.totalorder %s1080_s7, %s1076_s26 }
  0x39   : > { %686 = vst [vmem:[%s1327_s24 + $0x10] sm:$0xff] %v622_v27  ;;  %v503_v39 = vmul.f32 %v375_v36, %v247_v34  ;;  %v376_v42 = vld [vmem:[%s1302_s0 + $0x60] sm:$0xff]  ;;  %v377_v44 = vld [vmem:[%s1302_s0 + $0x68] sm:$0xff]  ;;  %v250_v46 = vld [vmem:[%s1295_s27 + $0x70] sm:$0xff] }
  0x3a   : > { %v624_v43 = vpack.c.bf16 %v501_v33, %v500_v32  ;;  %v504_v45 = vmul.f32 %v376_v42, %v248_v40  ;;  %v251_v47 = vld [vmem:[%s1295_s27 + $0x78] sm:$0xff]  ;;  %687 = vst [vmem:[%s1327_s24 + $0x18] sm:$0xff] %v623_v37  ;;  %v505_v49 = vmul.f32 %v377_v44, %v249_v41  ;;  %v378_v50 = vld [vmem:[%s1302_s0 + $0x70] sm:$0xff]  ;;  %v252_v52 = vld [vmem:[%s1295_s27 + $0x80] sm:$0xff]  ;;  %p1078_p5 = pnand %p1077_p4, %p1250_p9  ;;  %p1083_p10 = por %p1082_p8, %p1081_p7 }
  0x3b   : > { %v625_v48 = vpack.c.bf16 %v503_v39, %v502_v38  ;;  %v379_v51 = vld [vmem:[%s1302_s0 + $0x78] sm:$0xff]  ;;  %v506_v53 = vmul.f32 %v378_v50, %v250_v46  ;;  %v253_v55 = vld [vmem:[%s1295_s27 + $0x88] sm:$0xff]  ;;  %v380_v56 = vld [vmem:[%s1302_s0 + $0x80] sm:$0xff] }
  0x3c   : > { %688 = vst [vmem:[%s1327_s24 + $0x20] sm:$0xff] %v624_v43  ;;  %v507_v54 = vmul.f32 %v379_v51, %v251_v47  ;;  %v381_v57 = vld [vmem:[%s1302_s0 + $0x88] sm:$0xff]  ;;  %v626_v58 = vpack.c.bf16 %v505_v49, %v504_v45  ;;  %v508_v59 = vmul.f32 %v380_v56, %v252_v52  ;;  %v254_v61 = vld [vmem:[%s1295_s27 + $0x90] sm:$0xff]  ;;  %v255_v62 = vld [vmem:[%s1295_s27 + $0x98] sm:$0xff]  ;;  %p1079_p6 = pneg %p1078_p5 }
  0x3d   : > { %689 = vst [vmem:[%s1327_s24 + $0x28] sm:$0xff] %v625_v48  ;;  %v509_v60 = vmul.f32 %v381_v57, %v253_v55  ;;  %v382_v63 = vld [vmem:[%s1302_s0 + $0x90] sm:$0xff]  ;;  %v383_v1 = vld [vmem:[%s1302_s0 + $0x98] sm:$0xff]  ;;  %v256_v3 = vld [vmem:[%s1295_s27 + $0xa0] sm:$0xff] }
  0x3e   : > { %v627_v0 = vpack.c.bf16 %v507_v54, %v506_v53  ;;  %v510_v2 = vmul.f32 %v382_v63, %v254_v61  ;;  %v257_v4 = vld [vmem:[%s1295_s27 + $0xa8] sm:$0xff]  ;;  %690 = vst [vmem:[%s1327_s24 + $0x30] sm:$0xff] %v626_v58  ;;  %v511_v6 = vmul.f32 %v383_v1, %v255_v62  ;;  %v384_v7 = vld [vmem:[%s1302_s0 + $0xa0] sm:$0xff]  ;;  %v258_v9 = vld [vmem:[%s1295_s27 + $0xb0] sm:$0xff]  ;;  %p1084_p11 = pnand %p1083_p10, %p1079_p6 }
  0x3f   : > { %v628_v5 = vpack.c.bf16 %v509_v60, %v508_v59  ;;  %v385_v8 = vld [vmem:[%s1302_s0 + $0xa8] sm:$0xff]  ;;  %v512_v10 = vmul.f32 %v384_v7, %v256_v3  ;;  %v259_v12 = vld [vmem:[%s1295_s27 + $0xb8] sm:$0xff]  ;;  %v386_v13 = vld [vmem:[%s1302_s0 + $0xb0] sm:$0xff] }
  0x40   : > { %691 = vst [vmem:[%s1327_s24 + $0x38] sm:$0xff] %v627_v0  ;;  %v513_v11 = vmul.f32 %v385_v8, %v257_v4  ;;  %v387_v14 = vld [vmem:[%s1302_s0 + $0xb8] sm:$0xff]  ;;  %v629_v15 = vpack.c.bf16 %v511_v6, %v510_v2  ;;  %v514_v16 = vmul.f32 %v386_v13, %v258_v9  ;;  %v260_v18 = vld [vmem:[%s1295_s27 + $0xc0] sm:$0xff]  ;;  %v261_v19 = vld [vmem:[%s1295_s27 + $0xc8] sm:$0xff] }
  0x41   : > { %692 = vst [vmem:[%s1327_s24 + $0x40] sm:$0xff] %v628_v5  ;;  %v515_v17 = vmul.f32 %v387_v14, %v259_v12  ;;  %v388_v20 = vld [vmem:[%s1302_s0 + $0xc0] sm:$0xff]  ;;  %v389_v22 = vld [vmem:[%s1302_s0 + $0xc8] sm:$0xff]  ;;  %v262_v24 = vld [vmem:[%s1295_s27 + $0xd0] sm:$0xff] }
  0x42   : > { %v630_v21 = vpack.c.bf16 %v513_v11, %v512_v10  ;;  %v516_v23 = vmul.f32 %v388_v20, %v260_v18  ;;  %v263_v25 = vld [vmem:[%s1295_s27 + $0xd8] sm:$0xff]  ;;  %693 = vst [vmem:[%s1327_s24 + $0x48] sm:$0xff] %v629_v15  ;;  %v517_v27 = vmul.f32 %v389_v22, %v261_v19  ;;  %v390_v28 = vld [vmem:[%s1302_s0 + $0xd0] sm:$0xff]  ;;  %v264_v30 = vld [vmem:[%s1295_s27 + $0xe0] sm:$0xff] }
  0x43   : > { %v631_v26 = vpack.c.bf16 %v515_v17, %v514_v16  ;;  %v391_v29 = vld [vmem:[%s1302_s0 + $0xd8] sm:$0xff]  ;;  %v518_v31 = vmul.f32 %v390_v28, %v262_v24  ;;  %v265_v33 = vld [vmem:[%s1295_s27 + $0xe8] sm:$0xff]  ;;  %v392_v34 = vld [vmem:[%s1302_s0 + $0xe0] sm:$0xff] }
  0x44   : > { %694 = vst [vmem:[%s1327_s24 + $0x50] sm:$0xff] %v630_v21  ;;  %v519_v32 = vmul.f32 %v391_v29, %v263_v25  ;;  %v393_v35 = vld [vmem:[%s1302_s0 + $0xe8] sm:$0xff]  ;;  %v632_v36 = vpack.c.bf16 %v517_v27, %v516_v23  ;;  %v520_v37 = vmul.f32 %v392_v34, %v264_v30  ;;  %v266_v39 = vld [vmem:[%s1295_s27 + $0xf0] sm:$0xff]  ;;  %v267_v40 = vld [vmem:[%s1295_s27 + $0xf8] sm:$0xff] }
  0x45   : > { %695 = vst [vmem:[%s1327_s24 + $0x58] sm:$0xff] %v631_v26  ;;  %v521_v38 = vmul.f32 %v393_v35, %v265_v33  ;;  %v394_v41 = vld [vmem:[%s1302_s0 + $0xf0] sm:$0xff]  ;;  %v395_v43 = vld [vmem:[%s1302_s0 + $0xf8] sm:$0xff]  ;;  %v268_v45 = vld [vmem:[%s1295_s27 + $0x100] sm:$0xff] }
  0x46   : > { %v633_v42 = vpack.c.bf16 %v519_v32, %v518_v31  ;;  %v522_v44 = vmul.f32 %v394_v41, %v266_v39  ;;  %v269_v46 = vld [vmem:[%s1295_s27 + $0x108] sm:$0xff]  ;;  %696 = vst [vmem:[%s1327_s24 + $0x60] sm:$0xff] %v632_v36  ;;  %v523_v48 = vmul.f32 %v395_v43, %v267_v40  ;;  %v396_v49 = vld [vmem:[%s1302_s0 + $0x100] sm:$0xff]  ;;  %v270_v51 = vld [vmem:[%s1295_s27 + $0x110] sm:$0xff] }
  0x47   : > { %v634_v47 = vpack.c.bf16 %v521_v38, %v520_v37  ;;  %v397_v50 = vld [vmem:[%s1302_s0 + $0x108] sm:$0xff]  ;;  %v524_v52 = vmul.f32 %v396_v49, %v268_v45  ;;  %v271_v54 = vld [vmem:[%s1295_s27 + $0x118] sm:$0xff]  ;;  %v398_v55 = vld [vmem:[%s1302_s0 + $0x110] sm:$0xff] }
  0x48   : > { %697 = vst [vmem:[%s1327_s24 + $0x68] sm:$0xff] %v633_v42  ;;  %v525_v53 = vmul.f32 %v397_v50, %v269_v46  ;;  %v399_v56 = vld [vmem:[%s1302_s0 + $0x118] sm:$0xff]  ;;  %v635_v57 = vpack.c.bf16 %v523_v48, %v522_v44  ;;  %v526_v58 = vmul.f32 %v398_v55, %v270_v51  ;;  %v272_v60 = vld [vmem:[%s1295_s27 + $0x120] sm:$0xff]  ;;  %v273_v61 = vld [vmem:[%s1295_s27 + $0x128] sm:$0xff] }
  0x49   : > { %698 = vst [vmem:[%s1327_s24 + $0x70] sm:$0xff] %v634_v47  ;;  %v527_v59 = vmul.f32 %v399_v56, %v271_v54  ;;  %v400_v62 = vld [vmem:[%s1302_s0 + $0x120] sm:$0xff]  ;;  %v401_v0 = vld [vmem:[%s1302_s0 + $0x128] sm:$0xff]  ;;  %v274_v2 = vld [vmem:[%s1295_s27 + $0x130] sm:$0xff] }
  0x4a   : > { %v636_v63 = vpack.c.bf16 %v525_v53, %v524_v52  ;;  %v528_v1 = vmul.f32 %v400_v62, %v272_v60  ;;  %v275_v3 = vld [vmem:[%s1295_s27 + $0x138] sm:$0xff]  ;;  %699 = vst [vmem:[%s1327_s24 + $0x78] sm:$0xff] %v635_v57  ;;  %v529_v5 = vmul.f32 %v401_v0, %v273_v61  ;;  %v402_v6 = vld [vmem:[%s1302_s0 + $0x130] sm:$0xff]  ;;  %v276_v8 = vld [vmem:[%s1295_s27 + $0x140] sm:$0xff] }
  0x4b   : > { %v637_v4 = vpack.c.bf16 %v527_v59, %v526_v58  ;;  %v403_v7 = vld [vmem:[%s1302_s0 + $0x138] sm:$0xff]  ;;  %v530_v9 = vmul.f32 %v402_v6, %v274_v2  ;;  %v277_v11 = vld [vmem:[%s1295_s27 + $0x148] sm:$0xff]  ;;  %v404_v12 = vld [vmem:[%s1302_s0 + $0x140] sm:$0xff] }
  0x4c   : > { %700 = vst [vmem:[%s1327_s24 + $0x80] sm:$0xff] %v636_v63  ;;  %v531_v10 = vmul.f32 %v403_v7, %v275_v3  ;;  %v405_v13 = vld [vmem:[%s1302_s0 + $0x148] sm:$0xff]  ;;  %v638_v14 = vpack.c.bf16 %v529_v5, %v528_v1  ;;  %v532_v15 = vmul.f32 %v404_v12, %v276_v8  ;;  %v278_v17 = vld [vmem:[%s1295_s27 + $0x150] sm:$0xff]  ;;  %v279_v18 = vld [vmem:[%s1295_s27 + $0x158] sm:$0xff] }
  0x4d   : > { %701 = vst [vmem:[%s1327_s24 + $0x88] sm:$0xff] %v637_v4  ;;  %v533_v16 = vmul.f32 %v405_v13, %v277_v11  ;;  %v406_v19 = vld [vmem:[%s1302_s0 + $0x150] sm:$0xff]  ;;  %v407_v21 = vld [vmem:[%s1302_s0 + $0x158] sm:$0xff]  ;;  %v280_v23 = vld [vmem:[%s1295_s27 + $0x160] sm:$0xff] }
  0x4e   : > { %v639_v20 = vpack.c.bf16 %v531_v10, %v530_v9  ;;  %v534_v22 = vmul.f32 %v406_v19, %v278_v17  ;;  %v281_v24 = vld [vmem:[%s1295_s27 + $0x168] sm:$0xff]  ;;  %702 = vst [vmem:[%s1327_s24 + $0x90] sm:$0xff] %v638_v14  ;;  %v535_v26 = vmul.f32 %v407_v21, %v279_v18  ;;  %v408_v27 = vld [vmem:[%s1302_s0 + $0x160] sm:$0xff]  ;;  %v282_v29 = vld [vmem:[%s1295_s27 + $0x170] sm:$0xff] }
  0x4f   : > { %v640_v25 = vpack.c.bf16 %v533_v16, %v532_v15  ;;  %v409_v28 = vld [vmem:[%s1302_s0 + $0x168] sm:$0xff]  ;;  %v536_v30 = vmul.f32 %v408_v27, %v280_v23  ;;  %v283_v32 = vld [vmem:[%s1295_s27 + $0x178] sm:$0xff]  ;;  %v410_v33 = vld [vmem:[%s1302_s0 + $0x170] sm:$0xff] }
  0x50   : > { %703 = vst [vmem:[%s1327_s24 + $0x98] sm:$0xff] %v639_v20  ;;  %v537_v31 = vmul.f32 %v409_v28, %v281_v24  ;;  %v411_v34 = vld [vmem:[%s1302_s0 + $0x178] sm:$0xff]  ;;  %v641_v35 = vpack.c.bf16 %v535_v26, %v534_v22  ;;  %v538_v36 = vmul.f32 %v410_v33, %v282_v29  ;;  %v284_v38 = vld [vmem:[%s1295_s27 + $0x180] sm:$0xff]  ;;  %v285_v39 = vld [vmem:[%s1295_s27 + $0x188] sm:$0xff] }
  0x51   : > { %704 = vst [vmem:[%s1327_s24 + $0xa0] sm:$0xff] %v640_v25  ;;  %v539_v37 = vmul.f32 %v411_v34, %v283_v32  ;;  %v412_v40 = vld [vmem:[%s1302_s0 + $0x180] sm:$0xff]  ;;  %v413_v42 = vld [vmem:[%s1302_s0 + $0x188] sm:$0xff]  ;;  %v286_v44 = vld [vmem:[%s1295_s27 + $0x190] sm:$0xff] }
  0x52   : > { %v642_v41 = vpack.c.bf16 %v537_v31, %v536_v30  ;;  %v540_v43 = vmul.f32 %v412_v40, %v284_v38  ;;  %v287_v45 = vld [vmem:[%s1295_s27 + $0x198] sm:$0xff]  ;;  %705 = vst [vmem:[%s1327_s24 + $0xa8] sm:$0xff] %v641_v35  ;;  %v541_v47 = vmul.f32 %v413_v42, %v285_v39  ;;  %v414_v48 = vld [vmem:[%s1302_s0 + $0x190] sm:$0xff]  ;;  %v288_v50 = vld [vmem:[%s1295_s27 + $0x1a0] sm:$0xff] }
  0x53   : > { %v643_v46 = vpack.c.bf16 %v539_v37, %v538_v36  ;;  %v415_v49 = vld [vmem:[%s1302_s0 + $0x198] sm:$0xff]  ;;  %v542_v51 = vmul.f32 %v414_v48, %v286_v44  ;;  %v289_v53 = vld [vmem:[%s1295_s27 + $0x1a8] sm:$0xff]  ;;  %v416_v54 = vld [vmem:[%s1302_s0 + $0x1a0] sm:$0xff] }
  0x54   : > { %706 = vst [vmem:[%s1327_s24 + $0xb0] sm:$0xff] %v642_v41  ;;  %v543_v52 = vmul.f32 %v415_v49, %v287_v45  ;;  %v417_v55 = vld [vmem:[%s1302_s0 + $0x1a8] sm:$0xff]  ;;  %v644_v56 = vpack.c.bf16 %v541_v47, %v540_v43  ;;  %v544_v57 = vmul.f32 %v416_v54, %v288_v50  ;;  %v290_v59 = vld [vmem:[%s1295_s27 + $0x1b0] sm:$0xff]  ;;  %v291_v60 = vld [vmem:[%s1295_s27 + $0x1b8] sm:$0xff] }
  0x55   : > { %707 = vst [vmem:[%s1327_s24 + $0xb8] sm:$0xff] %v643_v46  ;;  %v545_v58 = vmul.f32 %v417_v55, %v289_v53  ;;  %v418_v61 = vld [vmem:[%s1302_s0 + $0x1b0] sm:$0xff]  ;;  %v419_v63 = vld [vmem:[%s1302_s0 + $0x1b8] sm:$0xff]  ;;  %v292_v1 = vld [vmem:[%s1295_s27 + $0x1c0] sm:$0xff] }
  0x56   : > { %v645_v62 = vpack.c.bf16 %v543_v52, %v542_v51  ;;  %v546_v0 = vmul.f32 %v418_v61, %v290_v59  ;;  %v293_v2 = vld [vmem:[%s1295_s27 + $0x1c8] sm:$0xff]  ;;  %708 = vst [vmem:[%s1327_s24 + $0xc0] sm:$0xff] %v644_v56  ;;  %v547_v4 = vmul.f32 %v419_v63, %v291_v60  ;;  %v420_v5 = vld [vmem:[%s1302_s0 + $0x1c0] sm:$0xff]  ;;  %v294_v7 = vld [vmem:[%s1295_s27 + $0x1d0] sm:$0xff] }
  0x57   : > { %v646_v3 = vpack.c.bf16 %v545_v58, %v544_v57  ;;  %v421_v6 = vld [vmem:[%s1302_s0 + $0x1c8] sm:$0xff]  ;;  %v548_v8 = vmul.f32 %v420_v5, %v292_v1  ;;  %v295_v10 = vld [vmem:[%s1295_s27 + $0x1d8] sm:$0xff]  ;;  %v422_v11 = vld [vmem:[%s1302_s0 + $0x1d0] sm:$0xff] }
  0x58   : > { %709 = vst [vmem:[%s1327_s24 + $0xc8] sm:$0xff] %v645_v62  ;;  %v549_v9 = vmul.f32 %v421_v6, %v293_v2  ;;  %v423_v12 = vld [vmem:[%s1302_s0 + $0x1d8] sm:$0xff]  ;;  %v647_v13 = vpack.c.bf16 %v547_v4, %v546_v0  ;;  %v550_v14 = vmul.f32 %v422_v11, %v294_v7  ;;  %v296_v16 = vld [vmem:[%s1295_s27 + $0x1e0] sm:$0xff]  ;;  %v297_v17 = vld [vmem:[%s1295_s27 + $0x1e8] sm:$0xff] }
  0x59   : > { %710 = vst [vmem:[%s1327_s24 + $0xd0] sm:$0xff] %v646_v3  ;;  %v551_v15 = vmul.f32 %v423_v12, %v295_v10  ;;  %v424_v18 = vld [vmem:[%s1302_s0 + $0x1e0] sm:$0xff]  ;;  %v425_v20 = vld [vmem:[%s1302_s0 + $0x1e8] sm:$0xff]  ;;  %v298_v22 = vld [vmem:[%s1295_s27 + $0x1f0] sm:$0xff] }
  0x5a   : > { %v648_v19 = vpack.c.bf16 %v549_v9, %v548_v8  ;;  %v552_v21 = vmul.f32 %v424_v18, %v296_v16  ;;  %v299_v23 = vld [vmem:[%s1295_s27 + $0x1f8] sm:$0xff]  ;;  %711 = vst [vmem:[%s1327_s24 + $0xd8] sm:$0xff] %v647_v13  ;;  %v553_v25 = vmul.f32 %v425_v20, %v297_v17  ;;  %v426_v26 = vld [vmem:[%s1302_s0 + $0x1f0] sm:$0xff]  ;;  %v300_v28 = vld [vmem:[%s1295_s27 + $0x200] sm:$0xff] }
  0x5b   : > { %v649_v24 = vpack.c.bf16 %v551_v15, %v550_v14  ;;  %v427_v27 = vld [vmem:[%s1302_s0 + $0x1f8] sm:$0xff]  ;;  %v554_v29 = vmul.f32 %v426_v26, %v298_v22  ;;  %v301_v31 = vld [vmem:[%s1295_s27 + $0x208] sm:$0xff]  ;;  %v428_v32 = vld [vmem:[%s1302_s0 + $0x200] sm:$0xff] }
  0x5c   : > { %712 = vst [vmem:[%s1327_s24 + $0xe0] sm:$0xff] %v648_v19  ;;  %v555_v30 = vmul.f32 %v427_v27, %v299_v23  ;;  %v429_v33 = vld [vmem:[%s1302_s0 + $0x208] sm:$0xff]  ;;  %v650_v34 = vpack.c.bf16 %v553_v25, %v552_v21  ;;  %v556_v35 = vmul.f32 %v428_v32, %v300_v28  ;;  %v302_v37 = vld [vmem:[%s1295_s27 + $0x210] sm:$0xff]  ;;  %v303_v38 = vld [vmem:[%s1295_s27 + $0x218] sm:$0xff] }
  0x5d   : > { %713 = vst [vmem:[%s1327_s24 + $0xe8] sm:$0xff] %v649_v24  ;;  %v557_v36 = vmul.f32 %v429_v33, %v301_v31  ;;  %v430_v39 = vld [vmem:[%s1302_s0 + $0x210] sm:$0xff]  ;;  %v431_v41 = vld [vmem:[%s1302_s0 + $0x218] sm:$0xff]  ;;  %v304_v43 = vld [vmem:[%s1295_s27 + $0x220] sm:$0xff] }
  0x5e   : > { %v651_v40 = vpack.c.bf16 %v555_v30, %v554_v29  ;;  %v558_v42 = vmul.f32 %v430_v39, %v302_v37  ;;  %v305_v44 = vld [vmem:[%s1295_s27 + $0x228] sm:$0xff]  ;;  %714 = vst [vmem:[%s1327_s24 + $0xf0] sm:$0xff] %v650_v34  ;;  %v559_v46 = vmul.f32 %v431_v41, %v303_v38  ;;  %v432_v47 = vld [vmem:[%s1302_s0 + $0x220] sm:$0xff]  ;;  %v306_v49 = vld [vmem:[%s1295_s27 + $0x230] sm:$0xff] }
  0x5f   : > { %v652_v45 = vpack.c.bf16 %v557_v36, %v556_v35  ;;  %v433_v48 = vld [vmem:[%s1302_s0 + $0x228] sm:$0xff]  ;;  %v560_v50 = vmul.f32 %v432_v47, %v304_v43  ;;  %v307_v52 = vld [vmem:[%s1295_s27 + $0x238] sm:$0xff]  ;;  %v434_v53 = vld [vmem:[%s1302_s0 + $0x230] sm:$0xff] }
  0x60   : > { %715 = vst [vmem:[%s1327_s24 + $0xf8] sm:$0xff] %v651_v40  ;;  %v561_v51 = vmul.f32 %v433_v48, %v305_v44  ;;  %v435_v54 = vld [vmem:[%s1302_s0 + $0x238] sm:$0xff]  ;;  %v653_v55 = vpack.c.bf16 %v559_v46, %v558_v42  ;;  %v562_v56 = vmul.f32 %v434_v53, %v306_v49  ;;  %v308_v58 = vld [vmem:[%s1295_s27 + $0x240] sm:$0xff]  ;;  %v309_v59 = vld [vmem:[%s1295_s27 + $0x248] sm:$0xff] }
  0x61   : > { %716 = vst [vmem:[%s1327_s24 + $0x100] sm:$0xff] %v652_v45  ;;  %v563_v57 = vmul.f32 %v435_v54, %v307_v52  ;;  %v436_v60 = vld [vmem:[%s1302_s0 + $0x240] sm:$0xff]  ;;  %v437_v62 = vld [vmem:[%s1302_s0 + $0x248] sm:$0xff]  ;;  %v310_v0 = vld [vmem:[%s1295_s27 + $0x250] sm:$0xff] }
  0x62   : > { %v654_v61 = vpack.c.bf16 %v561_v51, %v560_v50  ;;  %v564_v63 = vmul.f32 %v436_v60, %v308_v58  ;;  %v311_v1 = vld [vmem:[%s1295_s27 + $0x258] sm:$0xff]  ;;  %717 = vst [vmem:[%s1327_s24 + $0x108] sm:$0xff] %v653_v55  ;;  %v565_v3 = vmul.f32 %v437_v62, %v309_v59  ;;  %v438_v4 = vld [vmem:[%s1302_s0 + $0x250] sm:$0xff]  ;;  %v312_v6 = vld [vmem:[%s1295_s27 + $0x260] sm:$0xff] }
  0x63   : > { %v655_v2 = vpack.c.bf16 %v563_v57, %v562_v56  ;;  %v439_v5 = vld [vmem:[%s1302_s0 + $0x258] sm:$0xff]  ;;  %v566_v7 = vmul.f32 %v438_v4, %v310_v0  ;;  %v313_v9 = vld [vmem:[%s1295_s27 + $0x268] sm:$0xff]  ;;  %v440_v10 = vld [vmem:[%s1302_s0 + $0x260] sm:$0xff] }
  0x64   : > { %718 = vst [vmem:[%s1327_s24 + $0x110] sm:$0xff] %v654_v61  ;;  %v567_v8 = vmul.f32 %v439_v5, %v311_v1  ;;  %v441_v11 = vld [vmem:[%s1302_s0 + $0x268] sm:$0xff]  ;;  %v656_v12 = vpack.c.bf16 %v565_v3, %v564_v63  ;;  %v568_v13 = vmul.f32 %v440_v10, %v312_v6  ;;  %v314_v15 = vld [vmem:[%s1295_s27 + $0x270] sm:$0xff]  ;;  %v315_v16 = vld [vmem:[%s1295_s27 + $0x278] sm:$0xff] }
  0x65   : > { %719 = vst [vmem:[%s1327_s24 + $0x118] sm:$0xff] %v655_v2  ;;  %v569_v14 = vmul.f32 %v441_v11, %v313_v9  ;;  %v442_v17 = vld [vmem:[%s1302_s0 + $0x270] sm:$0xff]  ;;  %v443_v19 = vld [vmem:[%s1302_s0 + $0x278] sm:$0xff]  ;;  %v316_v21 = vld [vmem:[%s1295_s27 + $0x280] sm:$0xff] }
  0x66   : > { %v657_v18 = vpack.c.bf16 %v567_v8, %v566_v7  ;;  %v570_v20 = vmul.f32 %v442_v17, %v314_v15  ;;  %v317_v22 = vld [vmem:[%s1295_s27 + $0x288] sm:$0xff]  ;;  %720 = vst [vmem:[%s1327_s24 + $0x120] sm:$0xff] %v656_v12  ;;  %v571_v24 = vmul.f32 %v443_v19, %v315_v16  ;;  %v444_v25 = vld [vmem:[%s1302_s0 + $0x280] sm:$0xff]  ;;  %v318_v27 = vld [vmem:[%s1295_s27 + $0x290] sm:$0xff] }
  0x67   : > { %v658_v23 = vpack.c.bf16 %v569_v14, %v568_v13  ;;  %v445_v26 = vld [vmem:[%s1302_s0 + $0x288] sm:$0xff]  ;;  %v572_v28 = vmul.f32 %v444_v25, %v316_v21  ;;  %v319_v30 = vld [vmem:[%s1295_s27 + $0x298] sm:$0xff]  ;;  %v446_v31 = vld [vmem:[%s1302_s0 + $0x290] sm:$0xff] }
  0x68   : > { %721 = vst [vmem:[%s1327_s24 + $0x128] sm:$0xff] %v657_v18  ;;  %v573_v29 = vmul.f32 %v445_v26, %v317_v22  ;;  %v447_v32 = vld [vmem:[%s1302_s0 + $0x298] sm:$0xff]  ;;  %v659_v33 = vpack.c.bf16 %v571_v24, %v570_v20  ;;  %v574_v34 = vmul.f32 %v446_v31, %v318_v27  ;;  %v320_v36 = vld [vmem:[%s1295_s27 + $0x2a0] sm:$0xff]  ;;  %v321_v37 = vld [vmem:[%s1295_s27 + $0x2a8] sm:$0xff] }
  0x69   : > { %722 = vst [vmem:[%s1327_s24 + $0x130] sm:$0xff] %v658_v23  ;;  %v575_v35 = vmul.f32 %v447_v32, %v319_v30  ;;  %v448_v38 = vld [vmem:[%s1302_s0 + $0x2a0] sm:$0xff]  ;;  %v449_v40 = vld [vmem:[%s1302_s0 + $0x2a8] sm:$0xff]  ;;  %v322_v42 = vld [vmem:[%s1295_s27 + $0x2b0] sm:$0xff] }
  0x6a   : > { %v660_v39 = vpack.c.bf16 %v573_v29, %v572_v28  ;;  %v576_v41 = vmul.f32 %v448_v38, %v320_v36  ;;  %v323_v43 = vld [vmem:[%s1295_s27 + $0x2b8] sm:$0xff]  ;;  %723 = vst [vmem:[%s1327_s24 + $0x138] sm:$0xff] %v659_v33  ;;  %v577_v45 = vmul.f32 %v449_v40, %v321_v37  ;;  %v450_v46 = vld [vmem:[%s1302_s0 + $0x2b0] sm:$0xff]  ;;  %v324_v48 = vld [vmem:[%s1295_s27 + $0x2c0] sm:$0xff] }
  0x6b   : > { %v661_v44 = vpack.c.bf16 %v575_v35, %v574_v34  ;;  %v451_v47 = vld [vmem:[%s1302_s0 + $0x2b8] sm:$0xff]  ;;  %v578_v49 = vmul.f32 %v450_v46, %v322_v42  ;;  %v325_v51 = vld [vmem:[%s1295_s27 + $0x2c8] sm:$0xff]  ;;  %v452_v52 = vld [vmem:[%s1302_s0 + $0x2c0] sm:$0xff] }
  0x6c   : > { %724 = vst [vmem:[%s1327_s24 + $0x140] sm:$0xff] %v660_v39  ;;  %v579_v50 = vmul.f32 %v451_v47, %v323_v43  ;;  %v453_v53 = vld [vmem:[%s1302_s0 + $0x2c8] sm:$0xff]  ;;  %v662_v54 = vpack.c.bf16 %v577_v45, %v576_v41  ;;  %v580_v55 = vmul.f32 %v452_v52, %v324_v48  ;;  %v326_v57 = vld [vmem:[%s1295_s27 + $0x2d0] sm:$0xff]  ;;  %v327_v58 = vld [vmem:[%s1295_s27 + $0x2d8] sm:$0xff] }
  0x6d   : > { %725 = vst [vmem:[%s1327_s24 + $0x148] sm:$0xff] %v661_v44  ;;  %v581_v56 = vmul.f32 %v453_v53, %v325_v51  ;;  %v454_v59 = vld [vmem:[%s1302_s0 + $0x2d0] sm:$0xff]  ;;  %v455_v61 = vld [vmem:[%s1302_s0 + $0x2d8] sm:$0xff]  ;;  %v328_v63 = vld [vmem:[%s1295_s27 + $0x2e0] sm:$0xff] }
  0x6e   : > { %v663_v60 = vpack.c.bf16 %v579_v50, %v578_v49  ;;  %v582_v62 = vmul.f32 %v454_v59, %v326_v57  ;;  %v329_v0 = vld [vmem:[%s1295_s27 + $0x2e8] sm:$0xff]  ;;  %726 = vst [vmem:[%s1327_s24 + $0x150] sm:$0xff] %v662_v54  ;;  %v583_v2 = vmul.f32 %v455_v61, %v327_v58  ;;  %v456_v3 = vld [vmem:[%s1302_s0 + $0x2e0] sm:$0xff]  ;;  %v330_v5 = vld [vmem:[%s1295_s27 + $0x2f0] sm:$0xff] }
  0x6f   : > { %v664_v1 = vpack.c.bf16 %v581_v56, %v580_v55  ;;  %v457_v4 = vld [vmem:[%s1302_s0 + $0x2e8] sm:$0xff]  ;;  %v584_v6 = vmul.f32 %v456_v3, %v328_v63  ;;  %v331_v8 = vld [vmem:[%s1295_s27 + $0x2f8] sm:$0xff]  ;;  %v458_v9 = vld [vmem:[%s1302_s0 + $0x2f0] sm:$0xff] }
  0x70   : > { %727 = vst [vmem:[%s1327_s24 + $0x158] sm:$0xff] %v663_v60  ;;  %v585_v7 = vmul.f32 %v457_v4, %v329_v0  ;;  %v459_v10 = vld [vmem:[%s1302_s0 + $0x2f8] sm:$0xff]  ;;  %v665_v11 = vpack.c.bf16 %v583_v2, %v582_v62  ;;  %v586_v12 = vmul.f32 %v458_v9, %v330_v5  ;;  %v332_v14 = vld [vmem:[%s1295_s27 + $0x300] sm:$0xff]  ;;  %v333_v15 = vld [vmem:[%s1295_s27 + $0x308] sm:$0xff] }
  0x71   : > { %728 = vst [vmem:[%s1327_s24 + $0x160] sm:$0xff] %v664_v1  ;;  %v587_v13 = vmul.f32 %v459_v10, %v331_v8  ;;  %v460_v16 = vld [vmem:[%s1302_s0 + $0x300] sm:$0xff]  ;;  %v461_v18 = vld [vmem:[%s1302_s0 + $0x308] sm:$0xff]  ;;  %v334_v20 = vld [vmem:[%s1295_s27 + $0x310] sm:$0xff] }
  0x72   : > { %v666_v17 = vpack.c.bf16 %v585_v7, %v584_v6  ;;  %v588_v19 = vmul.f32 %v460_v16, %v332_v14  ;;  %v335_v21 = vld [vmem:[%s1295_s27 + $0x318] sm:$0xff]  ;;  %729 = vst [vmem:[%s1327_s24 + $0x168] sm:$0xff] %v665_v11  ;;  %v589_v23 = vmul.f32 %v461_v18, %v333_v15  ;;  %v462_v24 = vld [vmem:[%s1302_s0 + $0x310] sm:$0xff]  ;;  %v336_v26 = vld [vmem:[%s1295_s27 + $0x320] sm:$0xff] }
  0x73   : > { %v667_v22 = vpack.c.bf16 %v587_v13, %v586_v12  ;;  %v463_v25 = vld [vmem:[%s1302_s0 + $0x318] sm:$0xff]  ;;  %v590_v27 = vmul.f32 %v462_v24, %v334_v20  ;;  %v337_v29 = vld [vmem:[%s1295_s27 + $0x328] sm:$0xff]  ;;  %v464_v30 = vld [vmem:[%s1302_s0 + $0x320] sm:$0xff] }
  0x74   : > { %730 = vst [vmem:[%s1327_s24 + $0x170] sm:$0xff] %v666_v17  ;;  %v591_v28 = vmul.f32 %v463_v25, %v335_v21  ;;  %v465_v31 = vld [vmem:[%s1302_s0 + $0x328] sm:$0xff]  ;;  %v668_v32 = vpack.c.bf16 %v589_v23, %v588_v19  ;;  %v592_v33 = vmul.f32 %v464_v30, %v336_v26  ;;  %v338_v35 = vld [vmem:[%s1295_s27 + $0x330] sm:$0xff]  ;;  %v339_v36 = vld [vmem:[%s1295_s27 + $0x338] sm:$0xff] }
  0x75   : > { %731 = vst [vmem:[%s1327_s24 + $0x178] sm:$0xff] %v667_v22  ;;  %v593_v34 = vmul.f32 %v465_v31, %v337_v29  ;;  %v466_v37 = vld [vmem:[%s1302_s0 + $0x330] sm:$0xff]  ;;  %v467_v39 = vld [vmem:[%s1302_s0 + $0x338] sm:$0xff]  ;;  %v340_v41 = vld [vmem:[%s1295_s27 + $0x340] sm:$0xff] }
  0x76   : > { %v669_v38 = vpack.c.bf16 %v591_v28, %v590_v27  ;;  %v594_v40 = vmul.f32 %v466_v37, %v338_v35  ;;  %v341_v42 = vld [vmem:[%s1295_s27 + $0x348] sm:$0xff]  ;;  %732 = vst [vmem:[%s1327_s24 + $0x180] sm:$0xff] %v668_v32  ;;  %v595_v44 = vmul.f32 %v467_v39, %v339_v36  ;;  %v468_v45 = vld [vmem:[%s1302_s0 + $0x340] sm:$0xff]  ;;  %v342_v47 = vld [vmem:[%s1295_s27 + $0x350] sm:$0xff] }
  0x77   : > { %v670_v43 = vpack.c.bf16 %v593_v34, %v592_v33  ;;  %v469_v46 = vld [vmem:[%s1302_s0 + $0x348] sm:$0xff]  ;;  %v596_v48 = vmul.f32 %v468_v45, %v340_v41  ;;  %v343_v50 = vld [vmem:[%s1295_s27 + $0x358] sm:$0xff]  ;;  %v470_v51 = vld [vmem:[%s1302_s0 + $0x350] sm:$0xff] }
  0x78   : > { %733 = vst [vmem:[%s1327_s24 + $0x188] sm:$0xff] %v669_v38  ;;  %v597_v49 = vmul.f32 %v469_v46, %v341_v42  ;;  %v471_v52 = vld [vmem:[%s1302_s0 + $0x358] sm:$0xff]  ;;  %v671_v53 = vpack.c.bf16 %v595_v44, %v594_v40  ;;  %v598_v54 = vmul.f32 %v470_v51, %v342_v47  ;;  %v344_v56 = vld [vmem:[%s1295_s27 + $0x360] sm:$0xff]  ;;  %v345_v57 = vld [vmem:[%s1295_s27 + $0x368] sm:$0xff] }
  0x79   : > { %734 = vst [vmem:[%s1327_s24 + $0x190] sm:$0xff] %v670_v43  ;;  %v599_v55 = vmul.f32 %v471_v52, %v343_v50  ;;  %v472_v58 = vld [vmem:[%s1302_s0 + $0x360] sm:$0xff]  ;;  %v473_v60 = vld [vmem:[%s1302_s0 + $0x368] sm:$0xff]  ;;  %v346_v62 = vld [vmem:[%s1295_s27 + $0x370] sm:$0xff] }
  0x7a   : > { %v672_v59 = vpack.c.bf16 %v597_v49, %v596_v48  ;;  %v600_v61 = vmul.f32 %v472_v58, %v344_v56  ;;  %v347_v63 = vld [vmem:[%s1295_s27 + $0x378] sm:$0xff]  ;;  %735 = vst [vmem:[%s1327_s24 + $0x198] sm:$0xff] %v671_v53  ;;  %v601_v1 = vmul.f32 %v473_v60, %v345_v57  ;;  %v474_v2 = vld [vmem:[%s1302_s0 + $0x370] sm:$0xff]  ;;  %v348_v4 = vld [vmem:[%s1295_s27 + $0x380] sm:$0xff] }
  0x7b   : > { %v673_v0 = vpack.c.bf16 %v599_v55, %v598_v54  ;;  %v475_v3 = vld [vmem:[%s1302_s0 + $0x378] sm:$0xff]  ;;  %v602_v5 = vmul.f32 %v474_v2, %v346_v62  ;;  %v349_v7 = vld [vmem:[%s1295_s27 + $0x388] sm:$0xff]  ;;  %v476_v8 = vld [vmem:[%s1302_s0 + $0x380] sm:$0xff] }
  0x7c   : > { %736 = vst [vmem:[%s1327_s24 + $0x1a0] sm:$0xff] %v672_v59  ;;  %v603_v6 = vmul.f32 %v475_v3, %v347_v63  ;;  %v477_v9 = vld [vmem:[%s1302_s0 + $0x388] sm:$0xff]  ;;  %v674_v10 = vpack.c.bf16 %v601_v1, %v600_v61  ;;  %v604_v11 = vmul.f32 %v476_v8, %v348_v4  ;;  %v350_v13 = vld [vmem:[%s1295_s27 + $0x390] sm:$0xff]  ;;  %v351_v14 = vld [vmem:[%s1295_s27 + $0x398] sm:$0xff] }
  0x7d   : > { %737 = vst [vmem:[%s1327_s24 + $0x1a8] sm:$0xff] %v673_v0  ;;  %v605_v12 = vmul.f32 %v477_v9, %v349_v7  ;;  %v478_v15 = vld [vmem:[%s1302_s0 + $0x390] sm:$0xff]  ;;  %v479_v17 = vld [vmem:[%s1302_s0 + $0x398] sm:$0xff]  ;;  %v352_v19 = vld [vmem:[%s1295_s27 + $0x3a0] sm:$0xff] }
  0x7e   : > { %v675_v16 = vpack.c.bf16 %v603_v6, %v602_v5  ;;  %v606_v18 = vmul.f32 %v478_v15, %v350_v13  ;;  %v353_v20 = vld [vmem:[%s1295_s27 + $0x3a8] sm:$0xff]  ;;  %738 = vst [vmem:[%s1327_s24 + $0x1b0] sm:$0xff] %v674_v10  ;;  %v607_v22 = vmul.f32 %v479_v17, %v351_v14  ;;  %v480_v23 = vld [vmem:[%s1302_s0 + $0x3a0] sm:$0xff]  ;;  %v354_v25 = vld [vmem:[%s1295_s27 + $0x3b0] sm:$0xff] }
  0x7f   : > { %v676_v21 = vpack.c.bf16 %v605_v12, %v604_v11  ;;  %v481_v24 = vld [vmem:[%s1302_s0 + $0x3a8] sm:$0xff]  ;;  %v608_v26 = vmul.f32 %v480_v23, %v352_v19  ;;  %v355_v28 = vld [vmem:[%s1295_s27 + $0x3b8] sm:$0xff]  ;;  %v482_v29 = vld [vmem:[%s1302_s0 + $0x3b0] sm:$0xff] }
  0x80   : > { %739 = vst [vmem:[%s1327_s24 + $0x1b8] sm:$0xff] %v675_v16  ;;  %v609_v27 = vmul.f32 %v481_v24, %v353_v20  ;;  %v483_v30 = vld [vmem:[%s1302_s0 + $0x3b8] sm:$0xff]  ;;  %v677_v31 = vpack.c.bf16 %v607_v22, %v606_v18  ;;  %v610_v32 = vmul.f32 %v482_v29, %v354_v25  ;;  %v356_v34 = vld [vmem:[%s1295_s27 + $0x3c0] sm:$0xff]  ;;  %v357_v35 = vld [vmem:[%s1295_s27 + $0x3c8] sm:$0xff] }
  0x81   : > { %740 = vst [vmem:[%s1327_s24 + $0x1c0] sm:$0xff] %v676_v21  ;;  %v611_v33 = vmul.f32 %v483_v30, %v355_v28  ;;  %v484_v36 = vld [vmem:[%s1302_s0 + $0x3c0] sm:$0xff]  ;;  %v485_v38 = vld [vmem:[%s1302_s0 + $0x3c8] sm:$0xff]  ;;  %v358_v40 = vld [vmem:[%s1295_s27 + $0x3d0] sm:$0xff] }
  0x82   : > { %v678_v37 = vpack.c.bf16 %v609_v27, %v608_v26  ;;  %v612_v39 = vmul.f32 %v484_v36, %v356_v34  ;;  %v359_v41 = vld [vmem:[%s1295_s27 + $0x3d8] sm:$0xff]  ;;  %741 = vst [vmem:[%s1327_s24 + $0x1c8] sm:$0xff] %v677_v31  ;;  %v613_v43 = vmul.f32 %v485_v38, %v357_v35  ;;  %v486_v44 = vld [vmem:[%s1302_s0 + $0x3d0] sm:$0xff]  ;;  %v360_v46 = vld [vmem:[%s1295_s27 + $0x3e0] sm:$0xff] }
  0x83   : > { %v679_v42 = vpack.c.bf16 %v611_v33, %v610_v32  ;;  %v487_v45 = vld [vmem:[%s1302_s0 + $0x3d8] sm:$0xff]  ;;  %v614_v47 = vmul.f32 %v486_v44, %v358_v40  ;;  %v361_v49 = vld [vmem:[%s1295_s27 + $0x3e8] sm:$0xff]  ;;  %v488_v50 = vld [vmem:[%s1302_s0 + $0x3e0] sm:$0xff] }
  0x84   : > { %742 = vst [vmem:[%s1327_s24 + $0x1d0] sm:$0xff] %v678_v37  ;;  %v615_v48 = vmul.f32 %v487_v45, %v359_v41  ;;  %v489_v51 = vld [vmem:[%s1302_s0 + $0x3e8] sm:$0xff]  ;;  %v680_v52 = vpack.c.bf16 %v613_v43, %v612_v39  ;;  %v616_v53 = vmul.f32 %v488_v50, %v360_v46  ;;  %v362_v55 = vld [vmem:[%s1295_s27 + $0x3f0] sm:$0xff]  ;;  %v363_v56 = vld [vmem:[%s1295_s27 + $0x3f8] sm:$0xff] }
  0x85   : > { %743 = vst [vmem:[%s1327_s24 + $0x1d8] sm:$0xff] %v679_v42  ;;  %v617_v54 = vmul.f32 %v489_v51, %v361_v49  ;;  %v490_v57 = vld [vmem:[%s1302_s0 + $0x3f0] sm:$0xff]  ;;  %v491_v59 = vld [vmem:[%s1302_s0 + $0x3f8] sm:$0xff] }
  0x86   : > { %v681_v58 = vpack.c.bf16 %v615_v48, %v614_v47  ;;  %v618_v60 = vmul.f32 %v490_v57, %v362_v55  ;;  %744 = vst [vmem:[%s1327_s24 + $0x1e0] sm:$0xff] %v680_v52  ;;  %v619_v62 = vmul.f32 %v491_v59, %v363_v56 }
  0x87   : > { %v682_v61 = vpack.c.bf16 %v617_v54, %v616_v53 }
  0x88   : > { %745 = vst [vmem:[%s1327_s24 + $0x1e8] sm:$0xff] %v681_v58  ;;  %v683_v63 = vpack.c.bf16 %v619_v62, %v618_v60 }
  0x89   : > { %746 = vst [vmem:[%s1327_s24 + $0x1f0] sm:$0xff] %v682_v61 }
  0x8a   : > { %747 = vst [vmem:[%s1327_s24 + $0x1f8] sm:$0xff] %v683_v63 }
  0x8b   : > { %1087 = shalt.err (!%p1084_p11)
}
  0x8c   : > { %s1167_s15 = smov 256   ;;  %s1168_s0 = smov 512  }
  0x8d   : > { %s1169_s29 = smov 16  }
  0x8e   : > { %915 = dma.vmem_to_hbm [thread:$0]  (%p1250_p9), %s765_s5, 8192, %s767_s23, %s749_s8, %s1167_s15, %s1168_s0, %s1169_s29  }
  0x8f PF: > { %p929_p13 = scmp.ge.s32.totalorder %s1162_s16, 2  ;;  %s781_s24 = sand.u32 1, %s1134_s9  }
  0x90   : > { %s782_s3 = scalar_lea.sflag [#allocation4], %s781_s24 }
  0x91   : > { %p925_p0 = pnand %p929_p13, %p1256_p12 }
  0x93   : > { %p926_p1 = pneg %p925_p0 }
  0x95   : > { %1129 = dma.done.wait (%p926_p1), %s782_s3, 8192  }
  0x96   : > { %1131 = vsyncadd (%p926_p1), %s782_s3, 4294959104  ;;  %s21_s16 = sadd.s32 1, %s1162_s16   ;;  %s1695_s13 = sld [smem:[#allocation11_spill]] }
  0x97   : > { %p18_p2 = scmp.ge.s32.totalorder %s21_s16, 6   ;;  %s1696_s25 = sld [smem:[#allocation12_spill]] }
  0x98   : > { %s1697_s15 = sld [smem:[#allocation13_spill]]  ;;  %s1698_s9 = smov %s1138_s10 }
  0x99   : > { %s1699_s10 = smov %s1142_s11  ;;  %s1700_s11 = smov %s1265_s30 }
  0x9a   : > { %s1701_s12 = smov %s1154_s14  ;;  %20 = sbr.rel (!%p18_p2) target bundleno = 11 (0xb), region = 86 }
  0x9d   : > { %s1702_s14 = smov %s1696_s25 }
  0x9f   :  { %788 = vsyncpa [#allocation3], 1 }
  0xa0   :  { %790 = vsyncpa [#allocation3 + $0x1], 1 }
  0xa1   :  { %791 = vsyncpa [#allocation6], 1 }
  0xa2   :  { %793 = vsyncpa [#allocation6 + $0x1], 1 }
  0xa3   :  { %794 = vsyncpa [#allocation4], 1 }
  0xa4   :  { %796 = vsyncpa [#allocation4 + $0x1], 1 }

</bundles_post_ra>
